<compile_context>
chip_gen: v5e
topology: v5e:2x2
jax: 0.10.0
libtpu: 0.0.40
codegen_flags: <defaults>
</compile_context>

<pallas_src>
import functools

import jax
import jax.numpy as jnp
from jax import lax
from jax.experimental import pallas as pl
from jax.experimental.pallas import tpu as pltpu


def _round_up(x: int, m: int) -> int:
    return ((x + m - 1) // m) * m


def _linear_kernel(x_ref, w_ref, b_ref, o_ref, acc_ref):
    """One (tm, tn) output tile; accumulates over the K grid axis.

    x_ref:   (tm, tk)  activations tile
    w_ref:   (tn, tk)  weight tile in PyTorch (out, in) layout -> contract dim 1
    b_ref:   (1, tn)   bias tile for this N block
    o_ref:   (tm, tn)  output tile
    acc_ref: (tm, tn)  f32 VMEM accumulator (scratch)
    """
    k = pl.program_id(2)

    @pl.when(k == 0)
    def _init():
        acc_ref[...] = jnp.zeros_like(acc_ref)

    # y_tile += x_tile @ w_tile.T  (MXU, f32 accumulate); contracting dims
    # (1, 1) avoid materializing an HBM-transposed weight copy in the wrapper.
    acc_ref[...] += lax.dot_general(
        x_ref[...],
        w_ref[...],
        dimension_numbers=(((1,), (1,)), ((), ())),
        preferred_element_type=jnp.float32,
    )

    @pl.when(k == pl.num_programs(2) - 1)
    def _finalize():
        # Bias added exactly once per output tile, off the inner K loop.
        o_ref[...] = (acc_ref[...] + b_ref[...]).astype(o_ref.dtype)


@functools.partial(jax.jit, static_argnames=("tm", "tn", "tk"))
def linear_forward(x, weight, bias, *, tm=256, tn=256, tk=512):
    """y = x @ weight.T + bias  (PyTorch nn.Linear semantics).

    x:      (B, input_dim)
    weight: (output_dim, input_dim)   -- PyTorch layout, NOT transposed here
    bias:   (output_dim,)
    returns (B, output_dim)
    """
    B, K = x.shape
    N, Kw = weight.shape
    assert Kw == K, f"weight in_dim {Kw} != x in_dim {K}"

    # Clamp tiles for small problems while keeping (8,128)-tileable blocks.
    tm = min(tm, _round_up(B, 8))
    tn = min(tn, _round_up(N, 128))
    tk = min(tk, _round_up(K, 128))

    Bp = _round_up(B, tm)
    Np = _round_up(N, tn)
    Kp = _round_up(K, tk)

    # One-shot zero padding (exact for the matmul: padded K contributes 0).
    # TODO(synk): in a real model, pad/pack weight & bias once at load time
    # instead of per forward call.
    xp = x if (Bp == B and Kp == K) else jnp.pad(x, ((0, Bp - B), (0, Kp - K)))
    wp = weight if (Np == N and Kp == K) else jnp.pad(
        weight, ((0, Np - N), (0, Kp - K)))
    bp = bias.reshape(1, N)
    if Np != N:
        bp = jnp.pad(bp, ((0, 0), (0, Np - N)))

    grid = (Bp // tm, Np // tn, Kp // tk)

    bytes_acc = 4 * (Bp * Kp + Np * Kp + Bp * Np + Np)
    cost = pl.CostEstimate(
        flops=2 * Bp * Np * Kp, transcendentals=0, bytes_accessed=bytes_acc)

    out = pl.pallas_call(
        _linear_kernel,
        out_shape=jax.ShapeDtypeStruct((Bp, Np), x.dtype),
        grid_spec=pltpu.PrefetchScalarGridSpec(
            num_scalar_prefetch=0,
            grid=grid,
            in_specs=[
                pl.BlockSpec((tm, tk), lambda i, j, k: (i, k)),   # x tile
                pl.BlockSpec((tn, tk), lambda i, j, k: (j, k)),   # weight (out,in)
                pl.BlockSpec((1, tn), lambda i, j, k: (0, j)),    # bias per N block
            ],
            out_specs=pl.BlockSpec((tm, tn), lambda i, j, k: (i, j)),
            scratch_shapes=[pltpu.VMEM((tm, tn), jnp.float32)],
        ),
        compiler_params=pltpu.CompilerParams(
            # M/N parallel -> megacore sharding; K (reduction) arbitrary & last.
            dimension_semantics=("parallel", "parallel", "arbitrary"),
            # Comfortable scoped-VMEM budget (tiles use ~3 MiB double-buffered)
            # while staying well under v7x's 64 MiB physical VMEM.
            vmem_limit_bytes=32 * 1024 * 1024,
        ),
        cost_estimate=cost,
    )(xp, wp, bp)

    # Slice padding off (no-op when shapes were already aligned).
    return out[:B, :N]


if __name__ == "__main__":
    key = jax.random.PRNGKey(0)

    # --- Small demo shapes consistent with the module (batch=8, in=32, out=16) ---
    batch, input_dim, output_dim = 8, 32, 16
    kx, kw, kb = jax.random.split(key, 3)
    bound = 1.0 / (input_dim ** 0.5)
    weight = jax.random.uniform(
        kw, (output_dim, input_dim), dtype=jnp.float32, minval=-bound, maxval=bound)
    bias = jax.random.uniform(
        kb, (output_dim,), dtype=jnp.float32, minval=-bound, maxval=bound)
    x = jax.random.normal(kx, (batch, input_dim), dtype=jnp.float32)

    y = linear_forward(x, weight, bias)
    jax.block_until_ready(y)
    y_ref = x @ weight.T + bias
    assert y.shape == (batch, output_dim)
    assert jnp.allclose(y, y_ref, atol=1e-5, rtol=1e-5)

    # --- Second check exercising the multi-tile grid + padding path ---
    b2, k2, n2 = 512, 384, 320
    kx2, kw2, kb2 = jax.random.split(jax.random.PRNGKey(1), 3)
    bound2 = 1.0 / (k2 ** 0.5)
    w2 = jax.random.uniform(kw2, (n2, k2), dtype=jnp.float32,
                            minval=-bound2, maxval=bound2)
    b2v = jax.random.uniform(kb2, (n2,), dtype=jnp.float32,
                             minval=-bound2, maxval=bound2)
    x2 = jax.random.normal(kx2, (b2, k2), dtype=jnp.float32)

    y2 = linear_forward(x2, w2, b2v)
    jax.block_until_ready(y2)
    y2_ref = x2 @ w2.T + b2v
    assert y2.shape == (b2, n2)
    assert jnp.allclose(y2, y2_ref, atol=1e-4, rtol=1e-4)

    print("KERNEL_OK")
</pallas_src>

<mosaic_0001>
module attributes {stable_mosaic.version = 11 : i64} {
  func.func @_linear_kernel(%arg0: i32, %arg1: i32, %arg2: i32, %arg3: memref<8x128xf32, #tpu.memory_space<vmem>>, %arg4: memref<128x128xf32, #tpu.memory_space<vmem>>, %arg5: memref<1x128xf32, #tpu.memory_space<vmem>>, %arg6: memref<8x128xf32, #tpu.memory_space<vmem>>, %arg7: memref<8x128xf32, #tpu.memory_space<vmem>>) attributes {dimension_semantics = [#tpu.dimension_semantics<parallel>, #tpu.dimension_semantics<parallel>, #tpu.dimension_semantics<arbitrary>], iteration_bounds = array<i64: 1, 1, 1>, scalar_prefetch = 0 : i64, scratch_operands = 1 : i64, tpu.core_type = #tpu.core_type<tc>, window_params = [{transform_indices = @transform_0, window_bounds = array<i64: 8, 128>}, {transform_indices = @transform_1, window_bounds = array<i64: 128, 128>}, {transform_indices = @transform_2, window_bounds = array<i64: 1, 128>}, {transform_indices = @transform_3, window_bounds = array<i64: 8, 128>}]} {
    %c0_i32 = arith.constant 0 : i32
    %0 = arith.cmpi eq, %arg2, %c0_i32 : i32
    %1 = arith.extui %0 : i1 to i32
    %c0_i32_0 = arith.constant 0 : i32
    %2 = arith.cmpi ne, %1, %c0_i32_0 : i32
    scf.if %2 {
      %cst_10 = arith.constant 0.000000e+00 : f32
      %12 = vector.broadcast %cst_10 : f32 to vector<8x128xf32>
      %c0_11 = arith.constant 0 : index
      %c0_12 = arith.constant 0 : index
      %13 = vector.load %arg7[%c0_11, %c0_12] : memref<8x128xf32, #tpu.memory_space<vmem>>, vector<8x128xf32>
      tpu.vector_store %arg7[%c0_11, %c0_12], %12 {strides = array<i32>} : memref<8x128xf32, #tpu.memory_space<vmem>>, vector<8x128xf32>,
    } else {
    }
    %c0 = arith.constant 0 : index
    %c0_1 = arith.constant 0 : index
    %3 = vector.load %arg7[%c0, %c0_1] : memref<8x128xf32, #tpu.memory_space<vmem>>, vector<8x128xf32>
    %c0_2 = arith.constant 0 : index
    %c0_3 = arith.constant 0 : index
    %4 = vector.load %arg3[%c0_2, %c0_3] : memref<8x128xf32, #tpu.memory_space<vmem>>, vector<8x128xf32>
    %c0_4 = arith.constant 0 : index
    %c0_5 = arith.constant 0 : index
    %5 = vector.load %arg4[%c0_4, %c0_5] : memref<128x128xf32, #tpu.memory_space<vmem>>, vector<128x128xf32>
    %cst = arith.constant dense<0.000000e+00> : vector<8x128xf32>
    %6 = tpu.matmul %4, %5, %cst {dimension_numbers = #tpu.dot_dimension_numbers<[1], [1], [0], [0], [0, 0, 1, 0], [], []>} : vector<8x128xf32>, vector<128x128xf32>, vector<8x128xf32> -> vector<8x128xf32>
    %7 = arith.addf %3, %6 : vector<8x128xf32>
    %c0_6 = arith.constant 0 : index
    %c0_7 = arith.constant 0 : index
    %8 = vector.load %arg7[%c0_6, %c0_7] : memref<8x128xf32, #tpu.memory_space<vmem>>, vector<8x128xf32>
    tpu.vector_store %arg7[%c0_6, %c0_7], %7 {strides = array<i32>} : memref<8x128xf32, #tpu.memory_space<vmem>>, vector<8x128xf32>,
    %c0_i32_8 = arith.constant 0 : i32
    %9 = arith.cmpi eq, %arg2, %c0_i32_8 : i32
    %10 = arith.extui %9 : i1 to i32
    %c0_i32_9 = arith.constant 0 : i32
    %11 = arith.cmpi ne, %10, %c0_i32_9 : i32
    scf.if %11 {
      %c0_10 = arith.constant 0 : index
      %c0_11 = arith.constant 0 : index
      %12 = vector.load %arg7[%c0_10, %c0_11] : memref<8x128xf32, #tpu.memory_space<vmem>>, vector<8x128xf32>
      %c0_12 = arith.constant 0 : index
      %c0_13 = arith.constant 0 : index
      %13 = vector.load %arg5[%c0_12, %c0_13] : memref<1x128xf32, #tpu.memory_space<vmem>>, vector<1x128xf32>
      %14 = vector.broadcast %13 : vector<1x128xf32> to vector<8x128xf32>
      %15 = arith.addf %12, %14 : vector<8x128xf32>
      %c0_14 = arith.constant 0 : index
      %c0_15 = arith.constant 0 : index
      %16 = vector.load %arg6[%c0_14, %c0_15] : memref<8x128xf32, #tpu.memory_space<vmem>>, vector<8x128xf32>
      tpu.vector_store %arg6[%c0_14, %c0_15], %15 {strides = array<i32>} : memref<8x128xf32, #tpu.memory_space<vmem>>, vector<8x128xf32>,
    } else {
    }
    return
  }
  func.func @transform_0(%arg0: i32, %arg1: i32, %arg2: i32) -> (i32, i32) {
    %c0_i32 = arith.constant 0 : i32
    return %arg0, %arg2 : i32, i32
  }
  func.func @transform_1(%arg0: i32, %arg1: i32, %arg2: i32) -> (i32, i32) {
    %c0_i32 = arith.constant 0 : i32
    return %arg1, %arg2 : i32, i32
  }
  func.func @transform_2(%arg0: i32, %arg1: i32, %arg2: i32) -> (i32, i32) {
    %c0_i32 = arith.constant 0 : i32
    %c0_i32_0 = arith.constant 0 : i32
    return %c0_i32, %arg1 : i32, i32
  }
  func.func @transform_3(%arg0: i32, %arg1: i32, %arg2: i32) -> (i32, i32) {
    %c0_i32 = arith.constant 0 : i32
    return %arg0, %arg1 : i32, i32
  }
}

</mosaic_0001>

<bundles_post_ra>
// kernel: linear_forward.1
= control target key start
LH: loop header
LB: loop body
LE: loop exit
PB: predicated region body
PF: predicated region fallthrough
CT: control target
= control target key end

     0   :  { %s192_s0 = inlined_call_operand.vmem [shape: f32[8,128], index: 0, kind: input, shape index: {}]   ;;  %s193_s1 = inlined_call_operand.vmem [shape: f32[128,128], index: 1, kind: input, shape index: {}]   ;;  %s194_s2 = inlined_call_operand.vmem [shape: f32[1,128], index: 2, kind: input, shape index: {}]   ;;  %s195_s3 = inlined_call_operand.hbm [shape: f32[8,128], index: 3, kind: output, shape index: {}]  }
   0x1   :  { %v37_v0 = vld [vmem:[%s193_s1 + $0x78] sm:$0xff]  ;;  %v36_v1 = vld [vmem:[%s193_s1 + $0x70] sm:$0xff] }
   0x2   :  { %38 = vmatpush.xpose.msra.mxu0 %v37_v0 }
   0x3   :  { %8 = vsyncpa [#allocation4], 0  ;;  %v35_v2 = vld [vmem:[%s193_s1 + $0x68] sm:$0xff]  ;;  %v34_v3 = vld [vmem:[%s193_s1 + $0x60] sm:$0xff]  ;;  %s114_s21 = smov [#allocation3]   ;;  %s77_s25 = sshll.u32 %s195_s3, 4  ;;  %s78_s25 = int_to_ptr.hbm [resolvable:$true] %s77_s25 }
   0x4   :  { %v33_v4 = vld [vmem:[%s193_s1 + $0x58] sm:$0xff]  ;;  %v32_v5 = vld [vmem:[%s193_s1 + $0x50] sm:$0xff]  ;;  %v31_v6 = vld [vmem:[%s193_s1 + $0x48] sm:$0xff]  ;;  %s75_s22 = sshll.u32 %s114_s21, 4  ;;  %s76_s22 = int_to_ptr.vmem [resolvable:$true] %s75_s22 }
   0x5   :  { %v30_v7 = vld [vmem:[%s193_s1 + $0x40] sm:$0xff]  ;;  %v29_v8 = vld [vmem:[%s193_s1 + $0x38] sm:$0xff]  ;;  %v28_v9 = vld [vmem:[%s193_s1 + $0x30] sm:$0xff] }
   0x6   :  { %39 = vmatpush.xpose.msra.mxu0 %v36_v1  ;;  %v27_v10 = vld [vmem:[%s193_s1 + $0x28] sm:$0xff]  ;;  %v26_v11 = vld [vmem:[%s193_s1 + $0x20] sm:$0xff]  ;;  %v25_v12 = vld [vmem:[%s193_s1 + $0x18] sm:$0xff] }
   0x7   :  { %v24_v13 = vld [vmem:[%s193_s1 + $0x10] sm:$0xff]  ;;  %v23_v14 = vld [vmem:[%s193_s1 + $0x8] sm:$0xff]  ;;  %v22_v15 = vld [vmem:[%s193_s1] sm:$0xff] }
   0x8   :  { %v21_v16 = vld [vmem:[%s192_s0] sm:$0xff] }
   0x9   :  { %v87_v17 = vld [vmem:[%s194_s2] ss:$0 sm:$0xff] }
   0xa   :  { %40 = vmatpush.xpose.msra.mxu0 %v35_v2 }
   0xe   :  { %41 = vmatpush.xpose.msra.mxu0 %v34_v3 }
  0x12   :  { %42 = vmatpush.xpose.msra.mxu0 %v33_v4 }
  0x16   :  { %43 = vmatpush.xpose.msra.mxu0 %v32_v5 }
  0x1a   :  { %44 = vmatpush.xpose.msra.mxu0 %v31_v6 }
  0x1e   :  { %45 = vmatpush.xpose.msra.mxu0 %v30_v7 }
  0x22   :  { %46 = vmatpush.xpose.msra.mxu0 %v29_v8 }
  0x26   :  { %47 = vmatpush.xpose.msra.mxu0 %v28_v9 }
  0x2a   :  { %48 = vmatpush.xpose.msra.mxu0 %v27_v10 }
  0x2e   :  { %49 = vmatpush.xpose.msra.mxu0 %v26_v11 }
  0x32   :  { %50 = vmatpush.xpose.msra.mxu0 %v25_v12 }
  0x36   :  { %51 = vmatpush.xpose.msra.mxu0 %v24_v13 }
  0x3a   :  { %52 = vmatpush.xpose.msra.mxu0 %v23_v14 }
  0x3e   :  { %53 = vmatpush.xpose.msra.mxu0 %v22_v15 }
  0x41   :  { %54 = vmatmul.f32.vlgmr.msra.gmra.mxu0 %v21_v16 }
  0xbe   :  { %v55_v18 = vpop.f32.mrf.mxu0 }
  0xbf   :  { %v68_v19 = vadd.f32 %v87_v17, %v55_v18 }
  0xc1   :  { %69 = vst [vmem:[#allocation3] sm:$0xff] %v68_v19 }
  0xc2   :  { %80 = dma.vmem_to_hbm [thread:$0]  %s76_s22, 128, %s78_s25, [#allocation4]  }
  0xc3   :  { %112 = dma.done.wait [#allocation4], 128  }
  0xc4   :  { %113 = vsyncadd [#allocation4], 4294967168 }
  0xc5   :  { %85 = vsyncpa [#allocation4], 1 }

</bundles_post_ra>
